<compile_context>
chip_gen: v5e
topology: v5e:2x2
jax: 0.10.0
libtpu: 0.0.40
codegen_flags: <defaults>
</compile_context>

<pallas_src>
import functools

import jax
import jax.numpy as jnp
from jax.experimental import pallas as pl
from jax.experimental.pallas import tpu as pltpu

LANE = 128


def _round_up(n, m):
    return ((n + m - 1) // m) * m


def mlp_kernel(x_ref, w1_ref, b1_ref, w2_ref, b2_ref, w3_ref, b3_ref, o_ref):
    # x arrives in f32 at its true feature width (no pre-kernel pad/cast
    # pass); cast to bf16 on the VPU in VMEM. Three chained MXU matmuls
    # (bf16 operands, f32 accumulation); bias-add + ReLU run on the f32
    # accumulator (v5e has no bf16 VPU path).
    x = x_ref[...].astype(w1_ref.dtype)
    h1 = jnp.dot(x, w1_ref[...], preferred_element_type=jnp.float32) + b1_ref[...]
    h1 = jnp.maximum(h1, 0.0).astype(w2_ref.dtype)
    h2 = jnp.dot(h1, w2_ref[...], preferred_element_type=jnp.float32) + b2_ref[...]
    h2 = jnp.maximum(h2, 0.0).astype(w3_ref.dtype)
    logits = (
        jnp.dot(h2, w3_ref[...], preferred_element_type=jnp.float32) + b3_ref[...]
    )
    # bf16 store halves the padded-output HBM writeback; wrapper restores f32
    # on the tiny sliced (batch, num_classes) block.
    o_ref[...] = logits.astype(o_ref.dtype)


def prepare_params(params, compute_dtype=jnp.bfloat16):
    """One-time parameter prep (NOT per forward call).

    Zero-pads hidden/class output dims up to a multiple of 128 lanes so all
    stores and MXU operands are lane-dense (padded zeros contribute nothing —
    numerically exact) and casts matmul operands to bf16. w1 keeps its true
    K (= input_size) so x can be fed unpadded. Biases stay f32.
    """
    w1, b1, w2, b2, w3, b3 = params
    d_in, d_h = w1.shape
    _, d_h2 = w2.shape
    _, d_c = w3.shape
    p_h, p_h2, p_c = (_round_up(d, LANE) for d in (d_h, d_h2, d_c))

    def pad2(a, rows, cols):
        return jnp.zeros((rows, cols), a.dtype).at[: a.shape[0], : a.shape[1]].set(a)

    w1p = pad2(w1, d_in, p_h).astype(compute_dtype)   # true K, padded out-dim
    w2p = pad2(w2, p_h, p_h2).astype(compute_dtype)
    w3p = pad2(w3, p_h2, p_c).astype(compute_dtype)
    b1p = pad2(b1, 1, p_h)
    b2p = pad2(b2, 1, p_h2)
    b3p = pad2(b3, 1, p_c)
    return (w1p, b1p, w2p, b2p, w3p, b3p)


def _choose_row_tile(batch):
    # bf16 packs 16 rows per vreg -> keep tiles 16-row aligned.
    rows = _round_up(batch, 16)
    if rows <= 256:
        return rows  # single grid step; small batches are dispatch-bound
    # Large batch: 512-1024-row tiles amortize the ~0.35us per-grid-step
    # overhead (x/out tiles are only ~tm*KiB, a few MiB total even at 1024),
    # capped so the "parallel" grid keeps >= 2 steps and both v7x
    # TensorCores get rows. v5e/v6e (single TC) are unaffected by the cap.
    return min(1024, _round_up(rows // 2, 16))


@functools.partial(jax.jit, static_argnames=("num_classes",))
def neural_network_forward(x, padded_params, num_classes):
    """Forward pass equivalent to NeuralNetwork.forward.

    `padded_params` must come from prepare_params(). Returns f32 logits of
    shape (batch, num_classes).
    """
    w1, b1, w2, b2, w3, b3 = padded_params
    batch, d_in = x.shape
    p_c = w3.shape[1]

    tm = _choose_row_tile(batch)
    batch_p = _round_up(batch, tm)
    if batch_p != batch:
        # Row-only padding to the tile multiple; no feature-dim pad, no cast.
        x = jnp.pad(x, ((0, batch_p - batch), (0, 0)))

    def resident_spec(shape):
        # Constant index_map -> same block every grid step -> VMEM-resident.
        return pl.BlockSpec(shape, lambda i: (0,) * len(shape))

    out_padded = pl.pallas_call(
        mlp_kernel,
        out_shape=jax.ShapeDtypeStruct((batch_p, p_c), jnp.bfloat16),
        grid=(batch_p // tm,),
        in_specs=[
            # x tile at its true K (= d_in); legal because d_in is the full
            # trailing dim of the array.
            pl.BlockSpec((tm, d_in), lambda i: (i, 0)),
            resident_spec(w1.shape), resident_spec(b1.shape),
            resident_spec(w2.shape), resident_spec(b2.shape),
            resident_spec(w3.shape), resident_spec(b3.shape),
        ],
        out_specs=pl.BlockSpec((tm, p_c), lambda i: (i, 0)),
        compiler_params=pltpu.CompilerParams(
            # Rows shard across TensorCores on v7x. Footprint is a few MiB at
            # most (even tm=1024), so the default scoped-VMEM limit is fine —
            # no vmem_limit_bytes override.
            dimension_semantics=("parallel",),
        ),
    )(x, w1, b1, w2, b2, w3, b3)

    # Slice the logical rows/classes (padded rows/columns are junk/zeros and
    # never mix into real outputs) and restore the module's f32 logits on the
    # tiny result.
    return out_padded[:batch, :num_classes].astype(jnp.float32)


def init_params(key, input_size, hidden_size, num_classes):
    """Deterministic synthetic parameters, shapes matching the module."""
    ks = jax.random.split(key, 6)
    scale = 0.05
    w1 = scale * jax.random.normal(ks[0], (input_size, hidden_size), jnp.float32)
    b1 = scale * jax.random.normal(ks[1], (1, hidden_size), jnp.float32)
    w2 = scale * jax.random.normal(ks[2], (hidden_size, hidden_size * 2), jnp.float32)
    b2 = scale * jax.random.normal(ks[3], (1, hidden_size * 2), jnp.float32)
    w3 = scale * jax.random.normal(ks[4], (hidden_size * 2, num_classes), jnp.float32)
    b3 = scale * jax.random.normal(ks[5], (1, num_classes), jnp.float32)
    return (w1, b1, w2, b2, w3, b3)


def reference_forward(x, params):
    """Pure-JAX f32 reference (matches the PyTorch module exactly)."""
    w1, b1, w2, b2, w3, b3 = params
    h1 = jnp.maximum(x @ w1 + b1, 0.0)
    h2 = jnp.maximum(h1 @ w2 + b2, 0.0)
    return h2 @ w3 + b3


if __name__ == "__main__":
    input_size = 32
    hidden_size = 32
    num_classes = 5  # Yelp star ratings 1..5

    key = jax.random.PRNGKey(0)
    k_x, k_p = jax.random.split(key)
    params = init_params(k_p, input_size, hidden_size, num_classes)

    # One-time parameter prep (padding + bf16 cast), outside the forward path.
    padded_params = prepare_params(params)

    # batch=8 exercises the single-step small-batch path; batch=384 exercises
    # the multi-step parallel grid (tm=192, 2 steps).
    for batch in (8, 384):
        x = jax.random.normal(
            jax.random.fold_in(k_x, batch), (batch, input_size), jnp.float32
        )
        out = jax.block_until_ready(
            neural_network_forward(x, padded_params, num_classes)
        )
        ref = reference_forward(x, params)
        assert out.shape == (batch, num_classes)
        # bf16 matmul operands / bf16 logit store with f32 accumulation ->
        # loosened tolerance vs the f32 reference.
        assert jnp.allclose(out, ref, atol=3e-2, rtol=3e-2), (
            f"mismatch vs JAX reference at batch={batch}"
        )

    print("KERNEL_OK")
</pallas_src>

<mosaic_0001>
module attributes {stable_mosaic.version = 11 : i64} {
  func.func @mlp_kernel(%arg0: i32, %arg1: memref<16x32xf32, #tpu.memory_space<vmem>>, %arg2: memref<32x128xbf16, #tpu.memory_space<vmem>>, %arg3: memref<1x128xf32, #tpu.memory_space<vmem>>, %arg4: memref<128x128xbf16, #tpu.memory_space<vmem>>, %arg5: memref<1x128xf32, #tpu.memory_space<vmem>>, %arg6: memref<128x128xbf16, #tpu.memory_space<vmem>>, %arg7: memref<1x128xf32, #tpu.memory_space<vmem>>, %arg8: memref<16x128xbf16, #tpu.memory_space<vmem>>) attributes {dimension_semantics = [#tpu.dimension_semantics<parallel>], iteration_bounds = array<i64: 1>, scalar_prefetch = 0 : i64, scratch_operands = 0 : i64, tpu.core_type = #tpu.core_type<tc>, window_params = [{transform_indices = @transform_0, window_bounds = array<i64: 16, 32>}, {pipeline_mode = #tpu.pipeline_mode<synchronous>, transform_indices = @transform_1, window_bounds = array<i64: 32, 128>}, {pipeline_mode = #tpu.pipeline_mode<synchronous>, transform_indices = @transform_2, window_bounds = array<i64: 1, 128>}, {pipeline_mode = #tpu.pipeline_mode<synchronous>, transform_indices = @transform_3, window_bounds = array<i64: 128, 128>}, {pipeline_mode = #tpu.pipeline_mode<synchronous>, transform_indices = @transform_4, window_bounds = array<i64: 1, 128>}, {pipeline_mode = #tpu.pipeline_mode<synchronous>, transform_indices = @transform_5, window_bounds = array<i64: 128, 128>}, {pipeline_mode = #tpu.pipeline_mode<synchronous>, transform_indices = @transform_6, window_bounds = array<i64: 1, 128>}, {transform_indices = @transform_7, window_bounds = array<i64: 16, 128>}]} {
    %c0 = arith.constant 0 : index
    %c0_0 = arith.constant 0 : index
    %0 = vector.load %arg1[%c0, %c0_0] : memref<16x32xf32, #tpu.memory_space<vmem>>, vector<16x32xf32>
    %1 = arith.truncf %0 : vector<16x32xf32> to vector<16x32xbf16>
    %c0_1 = arith.constant 0 : index
    %c0_2 = arith.constant 0 : index
    %2 = vector.load %arg2[%c0_1, %c0_2] : memref<32x128xbf16, #tpu.memory_space<vmem>>, vector<32x128xbf16>
    %cst = arith.constant dense<0.000000e+00> : vector<16x128xf32>
    %3 = tpu.matmul %1, %2, %cst {dimension_numbers = #tpu.dot_dimension_numbers<[1], [0], [0], [1], [0, 0, 1, 1], [], []>} : vector<16x32xbf16>, vector<32x128xbf16>, vector<16x128xf32> -> vector<16x128xf32>
    %c0_3 = arith.constant 0 : index
    %c0_4 = arith.constant 0 : index
    %4 = vector.load %arg3[%c0_3, %c0_4] : memref<1x128xf32, #tpu.memory_space<vmem>>, vector<1x128xf32>
    %5 = vector.broadcast %4 : vector<1x128xf32> to vector<16x128xf32>
    %6 = arith.addf %3, %5 : vector<16x128xf32>
    %cst_5 = arith.constant 0.000000e+00 : f32
    %7 = vector.broadcast %cst_5 : f32 to vector<16x128xf32>
    %8 = arith.maximumf %6, %7 : vector<16x128xf32>
    %9 = arith.truncf %8 : vector<16x128xf32> to vector<16x128xbf16>
    %c0_6 = arith.constant 0 : index
    %c0_7 = arith.constant 0 : index
    %10 = vector.load %arg4[%c0_6, %c0_7] : memref<128x128xbf16, #tpu.memory_space<vmem>>, vector<128x128xbf16>
    %cst_8 = arith.constant dense<0.000000e+00> : vector<16x128xf32>
    %11 = tpu.matmul %9, %10, %cst_8 {dimension_numbers = #tpu.dot_dimension_numbers<[1], [0], [0], [1], [0, 0, 1, 1], [], []>} : vector<16x128xbf16>, vector<128x128xbf16>, vector<16x128xf32> -> vector<16x128xf32>
    %c0_9 = arith.constant 0 : index
    %c0_10 = arith.constant 0 : index
    %12 = vector.load %arg5[%c0_9, %c0_10] : memref<1x128xf32, #tpu.memory_space<vmem>>, vector<1x128xf32>
    %13 = vector.broadcast %12 : vector<1x128xf32> to vector<16x128xf32>
    %14 = arith.addf %11, %13 : vector<16x128xf32>
    %cst_11 = arith.constant 0.000000e+00 : f32
    %15 = vector.broadcast %cst_11 : f32 to vector<16x128xf32>
    %16 = arith.maximumf %14, %15 : vector<16x128xf32>
    %17 = arith.truncf %16 : vector<16x128xf32> to vector<16x128xbf16>
    %c0_12 = arith.constant 0 : index
    %c0_13 = arith.constant 0 : index
    %18 = vector.load %arg6[%c0_12, %c0_13] : memref<128x128xbf16, #tpu.memory_space<vmem>>, vector<128x128xbf16>
    %cst_14 = arith.constant dense<0.000000e+00> : vector<16x128xf32>
    %19 = tpu.matmul %17, %18, %cst_14 {dimension_numbers = #tpu.dot_dimension_numbers<[1], [0], [0], [1], [0, 0, 1, 1], [], []>} : vector<16x128xbf16>, vector<128x128xbf16>, vector<16x128xf32> -> vector<16x128xf32>
    %c0_15 = arith.constant 0 : index
    %c0_16 = arith.constant 0 : index
    %20 = vector.load %arg7[%c0_15, %c0_16] : memref<1x128xf32, #tpu.memory_space<vmem>>, vector<1x128xf32>
    %21 = vector.broadcast %20 : vector<1x128xf32> to vector<16x128xf32>
    %22 = arith.addf %19, %21 : vector<16x128xf32>
    %23 = arith.truncf %22 : vector<16x128xf32> to vector<16x128xbf16>
    %c0_17 = arith.constant 0 : index
    %c0_18 = arith.constant 0 : index
    %24 = vector.load %arg8[%c0_17, %c0_18] : memref<16x128xbf16, #tpu.memory_space<vmem>>, vector<16x128xbf16>
    tpu.vector_store %arg8[%c0_17, %c0_18], %23 {strides = array<i32>} : memref<16x128xbf16, #tpu.memory_space<vmem>>, vector<16x128xbf16>,
    return
  }
  func.func @transform_0(%arg0: i32) -> (i32, i32) {
    %c0_i32 = arith.constant 0 : i32
    %c0_i32_0 = arith.constant 0 : i32
    return %arg0, %c0_i32 : i32, i32
  }
  func.func @transform_1(%arg0: i32) -> (i32, i32) {
    %c0_i32 = arith.constant 0 : i32
    %c0_i32_0 = arith.constant 0 : i32
    %c0_i32_1 = arith.constant 0 : i32
    return %c0_i32, %c0_i32_0 : i32, i32
  }
  func.func @transform_2(%arg0: i32) -> (i32, i32) {
    %c0_i32 = arith.constant 0 : i32
    %c0_i32_0 = arith.constant 0 : i32
    %c0_i32_1 = arith.constant 0 : i32
    return %c0_i32, %c0_i32_0 : i32, i32
  }
  func.func @transform_3(%arg0: i32) -> (i32, i32) {
    %c0_i32 = arith.constant 0 : i32
    %c0_i32_0 = arith.constant 0 : i32
    %c0_i32_1 = arith.constant 0 : i32
    return %c0_i32, %c0_i32_0 : i32, i32
  }
  func.func @transform_4(%arg0: i32) -> (i32, i32) {
    %c0_i32 = arith.constant 0 : i32
    %c0_i32_0 = arith.constant 0 : i32
    %c0_i32_1 = arith.constant 0 : i32
    return %c0_i32, %c0_i32_0 : i32, i32
  }
  func.func @transform_5(%arg0: i32) -> (i32, i32) {
    %c0_i32 = arith.constant 0 : i32
    %c0_i32_0 = arith.constant 0 : i32
    %c0_i32_1 = arith.constant 0 : i32
    return %c0_i32, %c0_i32_0 : i32, i32
  }
  func.func @transform_6(%arg0: i32) -> (i32, i32) {
    %c0_i32 = arith.constant 0 : i32
    %c0_i32_0 = arith.constant 0 : i32
    %c0_i32_1 = arith.constant 0 : i32
    return %c0_i32, %c0_i32_0 : i32, i32
  }
  func.func @transform_7(%arg0: i32) -> (i32, i32) {
    %c0_i32 = arith.constant 0 : i32
    %c0_i32_0 = arith.constant 0 : i32
    return %arg0, %c0_i32 : i32, i32
  }
}

</mosaic_0001>

<bundles_post_ra>
// kernel: neural_network_forward.1
= control target key start
LH: loop header
LB: loop body
LE: loop exit
PB: predicated region body
PF: predicated region fallthrough
CT: control target
= control target key end

     0   :  { %12 = vsyncpa [#allocation3], 0  ;;  %s509_s0 = inlined_call_operand.vmem [shape: f32[16,32], index: 0, kind: input, shape index: {}]   ;;  %s510_s1 = inlined_call_operand.vmem [shape: bf16[32,128], index: 1, kind: input, shape index: {}]   ;;  %s511_s2 = inlined_call_operand.vmem [shape: f32[1,128], index: 2, kind: input, shape index: {}]   ;;  %s512_s3 = inlined_call_operand.hbm [shape: bf16[128,128], index: 3, kind: input, shape index: {}]   ;;  %s513_s4 = inlined_call_operand.vmem [shape: f32[1,128], index: 4, kind: input, shape index: {}]   ;;  %s514_s5 = inlined_call_operand.hbm [shape: bf16[128,128], index: 5, kind: input, shape index: {}]   ;;  %s515_s6 = inlined_call_operand.vmem [shape: f32[1,128], index: 6, kind: input, shape index: {}]   ;;  %s516_s7 = inlined_call_operand.vmem [shape: bf16[16,128], index: 7, kind: output, shape index: {}]  }
   0x1   :  { %s24_s26 = sshll.u32 %s512_s3, 4  ;;  %s25_s26 = int_to_ptr.hbm [resolvable:$true] %s24_s26 }
   0x2   :  { %13 = vsyncpa [#allocation5], 0  ;;  %s435_s27 = smov [#allocation2]   ;;  %s39_s8 = sshll.u32 %s514_s5, 4  ;;  %s40_s8 = int_to_ptr.hbm [resolvable:$true] %s39_s8 }
   0x3   :  { %s26_s28 = sshll.u32 %s435_s27, 4  ;;  %s436_s9 = smov 64   ;;  %s27_s28 = int_to_ptr.vmem [resolvable:$true] %s26_s28 }
   0x4   :  { %s437_s10 = smov 4   ;;  %s438_s11 = smov [#allocation4]  }
   0x5   :  { %32 = dma.hbm_to_vmem [thread:$0]  %s25_s26, 1024, %s27_s28, [#allocation3], %s436_s9, %s436_s9, %s437_s10  }
   0x6   :  { %s41_s12 = sshll.u32 %s438_s11, 4  ;;  %s42_s12 = int_to_ptr.vmem [resolvable:$true] %s41_s12 }
   0x7   :  { %47 = dma.hbm_to_vmem [thread:$0]  %s40_s8, 1024, %s42_s12, [#allocation5], %s436_s9, %s436_s9, %s437_s10  }
   0x8   :  { %431 = dma.done.wait [#allocation3], 1024  }
   0x9   :  { %432 = vsyncadd [#allocation3], 4294966272 }
   0xa   :  { %433 = dma.done.wait [#allocation5], 1024  }
   0xb   :  { %434 = vsyncadd [#allocation5], 4294966272  ;;  %v354_v0 = vld [vmem:[%s510_s1 + $0x8] sm:$0xff]  ;;  %v353_v1 = vld [vmem:[%s510_s1] sm:$0xff]  ;;  %vm82_vm0 = vcmask 261120  }
   0xc   :  { %v362_v2 = vld [vmem:[#allocation2 + $0x38] sm:$0xff]  ;;  %92 = vmatpush.bf16.msra.mxu0 %v354_v0  ;;  %v59_v3 = vld [vmem:[%s509_s0] sm:$0xff]  ;;  %v60_v4 = vld [vmem:[%s509_s0 + $0x8] sm:$0xff] }
   0xd   :  { %171 = vmatpush.bf16.msra.mxu1 %v362_v2  ;;  %v361_v5 = vld [vmem:[#allocation2 + $0x30] sm:$0xff]  ;;  %v61_v6 = vpack.c.bf16 %v60_v4, %v59_v3  ;;  %v360_v7 = vld [vmem:[#allocation2 + $0x28] sm:$0xff]  ;;  %v359_v8 = vld [vmem:[#allocation2 + $0x20] sm:$0xff] }
   0xe   :  { %v358_v9 = vld [vmem:[#allocation2 + $0x18] sm:$0xff]  ;;  %v357_v10 = vld [vmem:[#allocation2 + $0x10] sm:$0xff]  ;;  %v356_v11 = vld [vmem:[#allocation2 + $0x8] sm:$0xff] }
   0xf   :  { %v355_v12 = vld [vmem:[#allocation2] sm:$0xff]  ;;  %v370_v13 = vld [vmem:[#allocation4 + $0x38] sm:$0xff]  ;;  %v369_v14 = vld [vmem:[#allocation4 + $0x30] sm:$0xff] }
  0x10   :  { %93 = vmatpush.bf16.msra.mxu0 %v353_v1  ;;  %256 = vmatpush.bf16.msra.mxu2 %v370_v13  ;;  %v368_v15 = vld [vmem:[#allocation4 + $0x28] sm:$0xff]  ;;  %v367_v16 = vld [vmem:[#allocation4 + $0x20] sm:$0xff]  ;;  %v366_v25 = vld [vmem:[#allocation4 + $0x18] sm:$0xff] }
  0x11   :  { %172 = vmatpush.bf16.msra.mxu1 %v361_v5  ;;  %v380_v18 = vld [vmem:[%s511_s2] ss:$0 sm:$0xff]  ;;  %v365_v26 = vld [vmem:[#allocation4 + $0x10] sm:$0xff]  ;;  %v364_v27 = vld [vmem:[#allocation4 + $0x8] sm:$0xff] }
  0x12   :  { %v363_v28 = vld [vmem:[#allocation4] sm:$0xff] }
  0x13   :  { %288 = vmatmul.msk.bf16.vlgmr.msra.gmra.mxu0 %vm82_vm0, %v61_v6  ;;  %v381_v30 = vld [vmem:[%s513_s4] ss:$0 sm:$0xff] }
  0x14   :  { %257 = vmatpush.bf16.msra.mxu2 %v369_v14  ;;  %v382_v38 = vld [vmem:[%s515_s6] ss:$0 sm:$0xff] }
  0x15   :  { %173 = vmatpush.bf16.msra.mxu1 %v360_v7 }
  0x18   :  { %258 = vmatpush.bf16.msra.mxu2 %v368_v15 }
  0x19   :  { %174 = vmatpush.bf16.msra.mxu1 %v359_v8 }
  0x1c   :  { %259 = vmatpush.bf16.msra.mxu2 %v367_v16 }
  0x1d   :  { %175 = vmatpush.bf16.msra.mxu1 %v358_v9 }
  0x20   :  { %260 = vmatpush.bf16.msra.mxu2 %v366_v25 }
  0x21   :  { %176 = vmatpush.bf16.msra.mxu1 %v357_v10 }
  0x24   :  { %261 = vmatpush.bf16.msra.mxu2 %v365_v26 }
  0x25   :  { %177 = vmatpush.bf16.msra.mxu1 %v356_v11 }
  0x28   :  { %262 = vmatpush.bf16.msra.mxu2 %v364_v27 }
  0x29   :  { %178 = vmatpush.bf16.msra.mxu1 %v355_v12 }
  0x2c   :  { %263 = vmatpush.bf16.msra.mxu2 %v363_v28 }
  0x90   :  { %v95_v17 = vpop.f32.mrf.mxu0 }
  0x91   :  { %v96_v19 = vadd.f32 %v380_v18, %v95_v17 }
  0x93   :  { %v100_v22 = vmax.f32 %v96_v19, 0.0 }
  0x98   :  { %v97_v20 = vpop.f32.mrf.mxu0 }
  0x99   :  { %v98_v21 = vadd.f32 %v380_v18, %v97_v20 }
  0x9b   :  { %v101_v23 = vmax.f32 %v98_v21, 0.0 }
  0x9d   :  { %v102_v24 = vpack.c.bf16 %v101_v23, %v100_v22 }
  0x9f   :  { %179 = vmatmul.bf16.vlgmr.msra.gmra.mxu1 %v102_v24 }
 0x11c   :  { %v180_v29 = vpop.f32.mrf.mxu1 }
 0x11d   :  { %v181_v31 = vadd.f32 %v381_v30, %v180_v29 }
 0x11f   :  { %v185_v34 = vmax.f32 %v181_v31, 0.0 }
 0x124   :  { %v182_v32 = vpop.f32.mrf.mxu1 }
 0x125   :  { %v183_v33 = vadd.f32 %v381_v30, %v182_v32 }
 0x127   :  { %v186_v35 = vmax.f32 %v183_v33, 0.0 }
 0x129   :  { %v187_v36 = vpack.c.bf16 %v186_v35, %v185_v34 }
 0x12b   :  { %264 = vmatmul.bf16.vlgmr.msra.gmra.mxu2 %v187_v36 }
 0x1ae   :  { %v265_v37 = vpop.f32.mrf.mxu2 }
 0x1af   :  { %v266_v40 = vadd.f32 %v382_v38, %v265_v37 }
 0x1b6   :  { %v267_v39 = vpop.f32.mrf.mxu2 }
 0x1b7   :  { %v268_v41 = vadd.f32 %v382_v38, %v267_v39 }
 0x1b9   :  { %v374_v42 = vpack.c.bf16 %v268_v41, %v266_v40 }
 0x1bb   :  { %375 = vst [vmem:[%s516_s7] sm:$0xff] %v374_v42  }
 0x1bc   :  { %278 = vsyncpa [#allocation3], 1 }
 0x1bd   :  { %279 = vsyncpa [#allocation5], 1 }

</bundles_post_ra>
